<compile_context>
chip_gen: v6e
topology: v6e:2x2x1
jax: 0.10.0
libtpu: 0.0.40
codegen_flags: <defaults>
</compile_context>

<pallas_src>
import functools
import math

import jax
import jax.numpy as jnp
from jax import lax
from jax.experimental import pallas as pl
from jax.experimental.pallas import tpu as pltpu


def _round_up(a, b):
    return -(-a // b) * b


def _cdiv(a, b):
    return -(-a // b)


def _patch_expand_kernel(x_ref, w_ref, b_ref, beta_ref, m_ref, mtg_ref, o_ref,
                         *, inv_cout, eps):
    # x_ref   : (tm, K)    packed input voxel rows (native dtype; cast to w dtype for the MXU)
    # w_ref   : (K, Cw)    block-diagonal flattened ConvTranspose3d weight (lane-dense)
    # b_ref   : (1, Cw)    conv bias per output column (f32; 0 in pad columns)
    # beta_ref: (1, Cw)    LayerNorm beta per column (f32; 0 in pad columns)
    # m_ref   : (Cw, S)    column -> segment indicator (0/1 f32; pad columns all-zero)
    # mtg_ref : (S, Cw)    indicator transpose with LayerNorm gamma folded in per column
    # o_ref   : (tm, Cw)   normalized output rows (lane-dense store)
    x = x_ref[...].astype(w_ref.dtype)
    y = jnp.dot(x, w_ref[...], preferred_element_type=jnp.float32) + b_ref[...]

    # One-pass segmented LayerNorm statistics on the MXU (f32 operands for accuracy;
    # on v5e these could be cast to bf16 if the stat matmuls ever stop hiding under DMA).
    m = m_ref[...]
    s1 = jnp.dot(y, m, preferred_element_type=jnp.float32)          # (tm, S) sums
    s2 = jnp.dot(y * y, m, preferred_element_type=jnp.float32)      # (tm, S) sum of squares
    mean = s1 * inv_cout
    var = s2 * inv_cout - mean * mean
    scale = lax.rsqrt(var + eps)                                     # (tm, S)
    shift = -mean * scale                                            # (tm, S)

    # Broadcast compact stats to full width with gamma folded into the broadcast matrix:
    #   o = y * (scale*gamma)_col + (shift*gamma)_col + beta_col
    mtg = mtg_ref[...]
    scale_b = jnp.dot(scale, mtg, preferred_element_type=jnp.float32)
    shift_b = jnp.dot(shift, mtg, preferred_element_type=jnp.float32)
    o_ref[...] = (y * scale_b + shift_b + beta_ref[...]).astype(o_ref.dtype)


def patch_expanding_rows(x_rows, weight, bias, gamma, beta, *, eps=1e-5,
                         matmul_dtype=jnp.bfloat16, tm=None):
    """Core kernel wrapper.

    x_rows: (N, Cin) channels-last voxel rows (N = B*D*H*W, row-major over b,d,h,w).
    Returns (N, 8*Cout) rows, columns ordered (kd, kh, kw, cout).
    """
    N, Cin = x_rows.shape
    Cout = weight.shape[1]
    C8 = 8 * Cout
    out_dtype = x_rows.dtype
    out_bytes = jnp.dtype(out_dtype).itemsize
    x_bytes = jnp.dtype(x_rows.dtype).itemsize
    w_bytes = jnp.dtype(matmul_dtype).itemsize

    # --- voxel packing so the output row width is lane-dense (multiple of 128, no zero columns).
    pack = 128 // math.gcd(C8, 128)
    if pack > 8:
        pack = 1                         # fall back to lane padding for pathological tiny Cout
    Cvalid = pack * C8
    Cw = _round_up(Cvalid, 128)
    K = pack * Cin
    S = pack * 8

    if N % pack:
        x_rows = jnp.pad(x_rows, ((0, pack - N % pack), (0, 0)))
    Nr = x_rows.shape[0] // pack
    x_rows = x_rows.reshape(Nr, K)       # free reshape (row-major), no relayout copy

    # --- flattened weight, column order (p, kd, kh, kw, cout); block-diagonal for pack > 1.
    wflat = jnp.transpose(weight, (0, 2, 3, 4, 1)).reshape(Cin, C8)
    if pack > 1:
        eye = jnp.eye(pack, dtype=wflat.dtype)
        wflat = jnp.einsum('pq,ck->pcqk', eye, wflat).reshape(K, Cvalid)
    wflat = jnp.pad(wflat, ((0, 0), (0, Cw - Cvalid))).astype(matmul_dtype)

    bflat = jnp.pad(jnp.tile(bias.astype(jnp.float32), S), (0, Cw - Cvalid)).reshape(1, Cw)
    gflat = jnp.pad(jnp.tile(gamma.astype(jnp.float32), S), (0, Cw - Cvalid)).reshape(1, Cw)
    btflat = jnp.pad(jnp.tile(beta.astype(jnp.float32), S), (0, Cw - Cvalid)).reshape(1, Cw)

    # Segment-indicator matrix (pad columns map to no segment) and gamma-folded transpose.
    col = jnp.arange(Cw)
    m = ((col[:, None] // Cout == jnp.arange(S)[None, :]) & (col[:, None] < Cvalid)
         ).astype(jnp.float32)                               # (Cw, S)
    mtg = jnp.transpose(m) * gflat                            # (S, Cw)

    # --- row-tile auto-sizing: VMEM budget counts I/O double-buffers AND f32 intermediates.
    if tm is None:
        budget = 28 * 1024 * 1024
        fixed = 2 * K * Cw * w_bytes                          # resident weight (double-buffered)
        per_row = 2 * K * x_bytes + 2 * Cw * out_bytes + 5 * Cw * 4
        tm = max(8, min(4096, (budget - fixed) // per_row))
    tm = int(tm)
    if Nr <= 8:
        tm = Nr
    else:
        tm = max(8, min((tm // 8) * 8, (Nr // 8) * 8))
    n_tiles = _cdiv(Nr, tm)
    if Nr > 16:
        target = n_tiles + (n_tiles % 2)                      # >=2 tiles and even (v7x megacore)
        if target != n_tiles:
            tm = max(8, _round_up(_cdiv(Nr, target), 8))
            n_tiles = _cdiv(Nr, tm)

    cost = pl.CostEstimate(
        flops=2 * Nr * K * Cw + 4 * Nr * Cw * S + 4 * Nr * S * Cw,
        transcendentals=Nr * S,
        bytes_accessed=Nr * K * x_bytes + Nr * Cw * out_bytes + K * Cw * w_bytes,
    )

    out_rows = pl.pallas_call(
        functools.partial(_patch_expand_kernel, inv_cout=1.0 / Cout, eps=eps),
        out_shape=jax.ShapeDtypeStruct((Nr, Cw), out_dtype),
        grid_spec=pltpu.PrefetchScalarGridSpec(
            num_scalar_prefetch=0,
            grid=(n_tiles,),
            in_specs=[
                pl.BlockSpec((tm, K), lambda i: (i, 0)),
                pl.BlockSpec((K, Cw), lambda i: (0, 0)),
                pl.BlockSpec((1, Cw), lambda i: (0, 0)),
                pl.BlockSpec((1, Cw), lambda i: (0, 0)),
                pl.BlockSpec((Cw, S), lambda i: (0, 0)),
                pl.BlockSpec((S, Cw), lambda i: (0, 0)),
            ],
            out_specs=pl.BlockSpec((tm, Cw), lambda i: (i, 0)),
        ),
        compiler_params=pltpu.CompilerParams(
            dimension_semantics=("parallel",),
            vmem_limit_bytes=48 * 1024 * 1024,
        ),
        cost_estimate=cost,
    )(x_rows, wflat, bflat, btflat, m, mtg)

    # Unpack voxels from rows (free reshape); slice lane padding only in the fallback case.
    y_rows = out_rows.reshape(Nr * pack, Cw // pack)
    if Cw != Cvalid:
        y_rows = y_rows[:, :C8]
    return y_rows[:N]


def patch_expanding_channels_last(x_cl, weight, bias, gamma, beta, *, eps=1e-5,
                                  matmul_dtype=jnp.bfloat16, tm=None):
    """Channels-last fast path: x_cl (B, D, H, W, Cin) -> (B, 2D, 2H, 2W, Cout)."""
    B, D, H, W, Cin = x_cl.shape
    Cout = weight.shape[1]
    rows = patch_expanding_rows(x_cl.reshape(B * D * H * W, Cin), weight, bias, gamma, beta,
                                eps=eps, matmul_dtype=matmul_dtype, tm=tm)
    y = rows.reshape(B, D, H, W, 2, 2, 2, Cout)
    y = jnp.transpose(y, (0, 1, 4, 2, 5, 3, 6, 7))            # B, D, kd, H, kh, W, kw, Cout
    return y.reshape(B, 2 * D, 2 * H, 2 * W, Cout)


def patch_expanding_forward(x, weight, bias, gamma, beta, *, eps=1e-5,
                            matmul_dtype=jnp.bfloat16, tm=None):
    """Matches PatchExpanding_block.forward: x (B, Cin, D, H, W) NCDHW -> (B, Cout, 2D, 2H, 2W).

    # TODO(synk): inside the full XCA_decoder keep activations channels-last and call
    # patch_expanding_channels_last (or patch_expanding_rows) directly; the NCDHW transposes
    # below are pure layout plumbing that roughly double the HBM traffic of this mem-bound op.
    """
    x_cl = jnp.transpose(x, (0, 2, 3, 4, 1))
    y_cl = patch_expanding_channels_last(x_cl, weight, bias, gamma, beta,
                                         eps=eps, matmul_dtype=matmul_dtype, tm=tm)
    return jnp.transpose(y_cl, (0, 4, 1, 2, 3))


def _reference(x, weight, bias, gamma, beta, eps=1e-5):
    B, Cin, D, H, W = x.shape
    Cout = weight.shape[1]
    up = jnp.einsum('bcdhw,coxyz->bodxhywz', x, weight)
    up = up.reshape(B, Cout, 2 * D, 2 * H, 2 * W) + bias[None, :, None, None, None]
    xt = jnp.transpose(up, (0, 2, 3, 4, 1))
    mean = jnp.mean(xt, axis=-1, keepdims=True)
    var = jnp.mean((xt - mean) ** 2, axis=-1, keepdims=True)
    xt = (xt - mean) * lax.rsqrt(var + eps) * gamma + beta
    return jnp.transpose(xt, (0, 4, 1, 2, 3))


if __name__ == "__main__":
    key = jax.random.PRNGKey(0)
    B, Cin, D, H, W = 2, 16, 4, 4, 4          # embed_dim = 16 -> Cout = 8
    Cout = Cin // 2
    k1, k2, k3, k4, k5 = jax.random.split(key, 5)

    x = jax.random.normal(k1, (B, Cin, D, H, W), jnp.float32)
    # Deterministic synthetic parameters (shapes from nn.ConvTranspose3d / nn.LayerNorm).
    weight = 0.1 * jax.random.normal(k2, (Cin, Cout, 2, 2, 2), jnp.float32)
    bias = 0.1 * jax.random.normal(k3, (Cout,), jnp.float32)
    gamma = 1.0 + 0.1 * jax.random.normal(k4, (Cout,), jnp.float32)
    beta = 0.1 * jax.random.normal(k5, (Cout,), jnp.float32)

    ref = _reference(x, weight, bias, gamma, beta)

    # f32-matmul path (NCDHW, module semantics): tight check of the one-pass MXU LN stats.
    out_f32 = jax.block_until_ready(
        patch_expanding_forward(x, weight, bias, gamma, beta, matmul_dtype=jnp.float32))
    assert out_f32.shape == (B, Cout, 2 * D, 2 * H, 2 * W)
    assert jnp.allclose(out_f32, ref, rtol=1e-3, atol=1e-3), "f32 path mismatch vs reference"

    # Channels-last fast path (what the full decoder should call): same numerics, no NCDHW relayout.
    x_cl = jnp.transpose(x, (0, 2, 3, 4, 1))
    out_cl = jax.block_until_ready(
        patch_expanding_channels_last(x_cl, weight, bias, gamma, beta, matmul_dtype=jnp.float32))
    assert out_cl.shape == (B, 2 * D, 2 * H, 2 * W, Cout)
    ref_cl = jnp.transpose(ref, (0, 2, 3, 4, 1))
    assert jnp.allclose(out_cl, ref_cl, rtol=1e-3, atol=1e-3), "channels-last path mismatch"

    # Default bandwidth-optimized path (bf16 MXU operands, f32 LN/output): looser tolerance.
    out_bf16 = jax.block_until_ready(
        patch_expanding_forward(x, weight, bias, gamma, beta))
    assert out_bf16.shape == (B, Cout, 2 * D, 2 * H, 2 * W)
    assert jnp.allclose(out_bf16, ref, rtol=0.0, atol=5e-2), "bf16 path mismatch vs reference"

    print("KERNEL_OK")
</pallas_src>

<mosaic_0001>
module attributes {stable_mosaic.version = 11 : i64} {
  func.func @_patch_expand_kernel(%arg0: i32, %arg1: memref<32x32xf32, #tpu.memory_space<vmem>>, %arg2: memref<32x128xf32, #tpu.memory_space<vmem>>, %arg3: memref<1x128xf32, #tpu.memory_space<vmem>>, %arg4: memref<1x128xf32, #tpu.memory_space<vmem>>, %arg5: memref<128x16xf32, #tpu.memory_space<vmem>>, %arg6: memref<16x128xf32, #tpu.memory_space<vmem>>, %arg7: memref<32x128xf32, #tpu.memory_space<vmem>>) attributes {dimension_semantics = [#tpu.dimension_semantics<parallel>], iteration_bounds = array<i64: 2>, scalar_prefetch = 0 : i64, scratch_operands = 0 : i64, tpu.core_type = #tpu.core_type<tc>, window_params = [{transform_indices = @transform_0, window_bounds = array<i64: 32, 32>}, {pipeline_mode = #tpu.pipeline_mode<synchronous>, transform_indices = @transform_1, window_bounds = array<i64: 32, 128>}, {pipeline_mode = #tpu.pipeline_mode<synchronous>, transform_indices = @transform_2, window_bounds = array<i64: 1, 128>}, {pipeline_mode = #tpu.pipeline_mode<synchronous>, transform_indices = @transform_3, window_bounds = array<i64: 1, 128>}, {pipeline_mode = #tpu.pipeline_mode<synchronous>, transform_indices = @transform_4, window_bounds = array<i64: 128, 16>}, {pipeline_mode = #tpu.pipeline_mode<synchronous>, transform_indices = @transform_5, window_bounds = array<i64: 16, 128>}, {transform_indices = @transform_6, window_bounds = array<i64: 32, 128>}]} {
    %c0 = arith.constant 0 : index
    %c0_0 = arith.constant 0 : index
    %0 = vector.load %arg1[%c0, %c0_0] : memref<32x32xf32, #tpu.memory_space<vmem>>, vector<32x32xf32>
    %c0_1 = arith.constant 0 : index
    %c0_2 = arith.constant 0 : index
    %1 = vector.load %arg2[%c0_1, %c0_2] : memref<32x128xf32, #tpu.memory_space<vmem>>, vector<32x128xf32>
    %cst = arith.constant dense<0.000000e+00> : vector<32x128xf32>
    %2 = tpu.matmul %0, %1, %cst {dimension_numbers = #tpu.dot_dimension_numbers<[1], [0], [0], [1], [0, 0, 1, 1], [], []>} : vector<32x32xf32>, vector<32x128xf32>, vector<32x128xf32> -> vector<32x128xf32>
    %c0_3 = arith.constant 0 : index
    %c0_4 = arith.constant 0 : index
    %3 = vector.load %arg3[%c0_3, %c0_4] : memref<1x128xf32, #tpu.memory_space<vmem>>, vector<1x128xf32>
    %4 = vector.broadcast %3 : vector<1x128xf32> to vector<32x128xf32>
    %5 = arith.addf %2, %4 : vector<32x128xf32>
    %c0_5 = arith.constant 0 : index
    %c0_6 = arith.constant 0 : index
    %6 = vector.load %arg5[%c0_5, %c0_6] : memref<128x16xf32, #tpu.memory_space<vmem>>, vector<128x16xf32>
    %cst_7 = arith.constant dense<0.000000e+00> : vector<32x16xf32>
    %7 = tpu.matmul %5, %6, %cst_7 {dimension_numbers = #tpu.dot_dimension_numbers<[1], [0], [0], [1], [0, 0, 1, 1], [], []>} : vector<32x128xf32>, vector<128x16xf32>, vector<32x16xf32> -> vector<32x16xf32>
    %8 = arith.mulf %5, %5 : vector<32x128xf32>
    %cst_8 = arith.constant dense<0.000000e+00> : vector<32x16xf32>
    %9 = tpu.matmul %8, %6, %cst_8 {dimension_numbers = #tpu.dot_dimension_numbers<[1], [0], [0], [1], [0, 0, 1, 1], [], []>} : vector<32x128xf32>, vector<128x16xf32>, vector<32x16xf32> -> vector<32x16xf32>
    %cst_9 = arith.constant 1.250000e-01 : f32
    %10 = vector.broadcast %cst_9 : f32 to vector<32x16xf32>
    %11 = arith.mulf %7, %10 : vector<32x16xf32>
    %cst_10 = arith.constant 1.250000e-01 : f32
    %12 = vector.broadcast %cst_10 : f32 to vector<32x16xf32>
    %13 = arith.mulf %9, %12 : vector<32x16xf32>
    %14 = arith.mulf %11, %11 : vector<32x16xf32>
    %15 = arith.subf %13, %14 : vector<32x16xf32>
    %cst_11 = arith.constant 9.99999974E-6 : f32
    %16 = vector.broadcast %cst_11 : f32 to vector<32x16xf32>
    %17 = arith.addf %15, %16 : vector<32x16xf32>
    %18 = math.rsqrt %17 : vector<32x16xf32>
    %cst_12 = arith.constant 0.000000e+00 : f32
    %19 = vector.broadcast %cst_12 : f32 to vector<32x16xf32>
    %20 = arith.subf %19, %11 : vector<32x16xf32>
    %21 = arith.mulf %20, %18 : vector<32x16xf32>
    %c0_13 = arith.constant 0 : index
    %c0_14 = arith.constant 0 : index
    %22 = vector.load %arg6[%c0_13, %c0_14] : memref<16x128xf32, #tpu.memory_space<vmem>>, vector<16x128xf32>
    %cst_15 = arith.constant dense<0.000000e+00> : vector<32x128xf32>
    %23 = tpu.matmul %18, %22, %cst_15 {dimension_numbers = #tpu.dot_dimension_numbers<[1], [0], [0], [1], [0, 0, 1, 1], [], []>} : vector<32x16xf32>, vector<16x128xf32>, vector<32x128xf32> -> vector<32x128xf32>
    %cst_16 = arith.constant dense<0.000000e+00> : vector<32x128xf32>
    %24 = tpu.matmul %21, %22, %cst_16 {dimension_numbers = #tpu.dot_dimension_numbers<[1], [0], [0], [1], [0, 0, 1, 1], [], []>} : vector<32x16xf32>, vector<16x128xf32>, vector<32x128xf32> -> vector<32x128xf32>
    %25 = arith.mulf %5, %23 : vector<32x128xf32>
    %26 = arith.addf %25, %24 : vector<32x128xf32>
    %c0_17 = arith.constant 0 : index
    %c0_18 = arith.constant 0 : index
    %27 = vector.load %arg4[%c0_17, %c0_18] : memref<1x128xf32, #tpu.memory_space<vmem>>, vector<1x128xf32>
    %28 = vector.broadcast %27 : vector<1x128xf32> to vector<32x128xf32>
    %29 = arith.addf %26, %28 : vector<32x128xf32>
    %c0_19 = arith.constant 0 : index
    %c0_20 = arith.constant 0 : index
    %30 = vector.load %arg7[%c0_19, %c0_20] : memref<32x128xf32, #tpu.memory_space<vmem>>, vector<32x128xf32>
    tpu.vector_store %arg7[%c0_19, %c0_20], %29 {strides = array<i32>} : memref<32x128xf32, #tpu.memory_space<vmem>>, vector<32x128xf32>,
    return
  }
  func.func @transform_0(%arg0: i32) -> (i32, i32) {
    %c0_i32 = arith.constant 0 : i32
    %c0_i32_0 = arith.constant 0 : i32
    return %arg0, %c0_i32 : i32, i32
  }
  func.func @transform_1(%arg0: i32) -> (i32, i32) {
    %c0_i32 = arith.constant 0 : i32
    %c0_i32_0 = arith.constant 0 : i32
    %c0_i32_1 = arith.constant 0 : i32
    return %c0_i32, %c0_i32_0 : i32, i32
  }
  func.func @transform_2(%arg0: i32) -> (i32, i32) {
    %c0_i32 = arith.constant 0 : i32
    %c0_i32_0 = arith.constant 0 : i32
    %c0_i32_1 = arith.constant 0 : i32
    return %c0_i32, %c0_i32_0 : i32, i32
  }
  func.func @transform_3(%arg0: i32) -> (i32, i32) {
    %c0_i32 = arith.constant 0 : i32
    %c0_i32_0 = arith.constant 0 : i32
    %c0_i32_1 = arith.constant 0 : i32
    return %c0_i32, %c0_i32_0 : i32, i32
  }
  func.func @transform_4(%arg0: i32) -> (i32, i32) {
    %c0_i32 = arith.constant 0 : i32
    %c0_i32_0 = arith.constant 0 : i32
    %c0_i32_1 = arith.constant 0 : i32
    return %c0_i32, %c0_i32_0 : i32, i32
  }
  func.func @transform_5(%arg0: i32) -> (i32, i32) {
    %c0_i32 = arith.constant 0 : i32
    %c0_i32_0 = arith.constant 0 : i32
    %c0_i32_1 = arith.constant 0 : i32
    return %c0_i32, %c0_i32_0 : i32, i32
  }
  func.func @transform_6(%arg0: i32) -> (i32, i32) {
    %c0_i32 = arith.constant 0 : i32
    %c0_i32_0 = arith.constant 0 : i32
    return %arg0, %c0_i32 : i32, i32
  }
}

</mosaic_0001>

<bundles_post_ra>
// kernel: tpu_custom_call.1
= control target key start
LH: loop header
LB: loop body
LE: loop exit
PB: predicated region body
PF: predicated region fallthrough
CT: control target
= control target key end

     0   :  { %11 = vsyncpa [#allocation3], 0  ;;  %s1447_s0 = inlined_call_operand.vmem [shape: f32[64,32], index: 0, kind: input, shape index: {}]   ;;  %s1448_s1 = inlined_call_operand.vmem [shape: f32[32,128], index: 1, kind: input, shape index: {}]   ;;  %s1449_s2 = inlined_call_operand.vmem [shape: f32[1,128], index: 2, kind: input, shape index: {}]   ;;  %s1450_s3 = inlined_call_operand.vmem [shape: f32[1,128], index: 3, kind: input, shape index: {}]   ;;  %s1451_s4 = inlined_call_operand.vmem [shape: f32[128,16], index: 4, kind: input, shape index: {}]   ;;  %s1452_s5 = inlined_call_operand.vmem [shape: f32[16,128], index: 5, kind: input, shape index: {}]   ;;  %s1453_s6 = inlined_call_operand.hbm [shape: f32[64,128], index: 6, kind: output, shape index: {}]  }
   0x1   :  { %13 = vsyncpa [#allocation3 + $0x1], 0  ;;  %s1234_s21 = smov 0   ;;  %s1236_s22 = smov 0  }
   0x2   :  { %s1238_s23 = smov 0   ;;  %s1240_s24 = smov 0  }
   0x3 LB: > { %s1255_s25 = sadd.s32 4294967295, %s1194_s24   ;;  %s884_s26 = sadd.s32 4294967294, %s1194_s24   ;;  %s1194_s24 = sphi %s1240_s24, %s1459_s24   ;;  %s1190_s23 = sphi %s1238_s23, %s1458_s23   ;;  %s1186_s22 = sphi %s1236_s22, %s1457_s22   ;;  %s1182_s21 = sphi %s1234_s21, %s1456_s21  }
   0x4   : > { %s1259_s27 = sadd.s32 1, %s1194_s24   ;;  %s157_s28 = sadd.s32 1, %s1190_s23 }
   0x5   : > { %s154_s29 = ssub.s32 %s1194_s24, %s1259_s27  ;;  %p167_p0 = scmp.ne.s32.totalorder %s1190_s23, %s1186_s22 }
   0x6   : > { %p155_p1 = scmp.eq.s32.totalorder %s154_s29, 0  ;;  %p168_p2 = scmp.eq.s32.totalorder %s1255_s25, 1 }
   0x7   : > { %p173_p3 = scmp.ne.s32.totalorder %s1186_s22, %s1182_s21  ;;  %p174_p4 = scmp.eq.s32.totalorder %s884_s26, 1 }
   0x8   : > { %s1270_s30 = scalar_select %p155_p1, %s1190_s23, %s157_s28  }
   0x9   : > { %p1272_p5 = por %p168_p2, %p167_p0  ;;  %p1276_p6 = por %p174_p4, %p173_p3 }
   0xa   : > { %p887_p7 = scmp.ge.s32.totalorder %s1194_s24, 1  ;;  %p216_p8 = scmp.lt.s32.totalorder %s1194_s24, 3 }
   0xc   : > { %p217_p9 = pnand %p887_p7, %p216_p8 }
   0xd   : > { %s889_s13 = sshll.u32 (!%p217_p9), %s1255_s25, 2  ;;  %s910_s26 = sshll.u32 (!%p217_p9), %s1255_s25, 9 }
   0xe   : > { %220 = sbr.rel (%p217_p9) target bundleno = 665 (0x299), region = 44  ;;  %p247_p10 = scmp.lt.s32.totalorder (!%p217_p9), %s889_s13, 7 }
   0xf   : > { %s1196_s11 = smov (!%p217_p9), [#allocation2]  }
  0x13   : > { %v260_v0 = vld [vmem:[%s1448_s1 + $0x18] sm:$0xff]  ;;  %v259_v1 = vld [vmem:[%s1448_s1 + $0x10] sm:$0xff]  ;;  %v258_v4 = vld [vmem:[%s1448_s1 + $0x8] sm:$0xff]  ;;  %s1461_s13 = smov (!%p247_p10, %s889_s13), 7  ;;  %vm268_vm0 = vcmask 261120   ;;  %vm590_vm1 = vcmask 130048  }
  0x14   : > { %971 = vmatprep.subr.mxu0 %v260_v0  ;;  %v381_v2 = vld [vmem:[%s1451_s4 + $0x78] sm:$0xff]  ;;  %v380_v3 = vld [vmem:[%s1451_s4 + $0x70] sm:$0xff]  ;;  %v379_v5 = vld [vmem:[%s1451_s4 + $0x68] sm:$0xff]  ;;  %s890_s9 = sshll.u32 %s1461_s13, 3  ;;  %s243_s13 = sand.u32 1, %s1186_s22  }
  0x15   : > { %972 = vmatpush3.msra.mxu0 %v260_v0  ;;  %985 = vmatprep.subr.mxu1 %v381_v2  ;;  %v257_v6 = vld [vmem:[%s1448_s1] sm:$0xff]  ;;  %s250_s12 = scalar_lea.vmem %s1447_s0, %s890_s9  ;;  %v377_v12 = vld [vmem:[%s1451_s4 + $0x58] sm:$0xff]  ;;  %v376_v13 = vld [vmem:[%s1451_s4 + $0x50] sm:$0xff]  ;;  %s888_s16 = sshll.u32 %s243_s13, 5 }
  0x16   : > { %973 = vmatprep.subr.mxu0 %v259_v1  ;;  %986 = vmatpush3.msra.mxu1 %v381_v2  ;;  %v253_v7 = vld [vmem:[%s250_s12] sm:$0xff]  ;;  %v254_v8 = vld [vmem:[%s250_s12 + $0x8] sm:$0xff]  ;;  %v255_v9 = vld [vmem:[%s250_s12 + $0x10] sm:$0xff]  ;;  %s245_s19 = scalar_lea.vmem [#allocation2], %s888_s16  ;;  %s1403_s9 = scalar_lea.hbm %s1453_s6, %s910_s26 }
  0x17   : > { %974 = vmatpush3.msra.mxu0 %v259_v1  ;;  %987 = vmatprep.subr.mxu1 %v380_v3  ;;  %v378_v10 = vld [vmem:[%s1451_s4 + $0x60] sm:$0xff]  ;;  %v256_v11 = vld [vmem:[%s250_s12 + $0x18] sm:$0xff]  ;;  %v375_v14 = vld [vmem:[%s1451_s4 + $0x48] sm:$0xff]  ;;  %s822_s20 = sshll.u32 %s245_s19, 4  ;;  %s1407_s10 = scalar_lea.sflag [#allocation3], %s243_s13  ;;  %s1398_s20 = int_to_ptr.vmem [resolvable:$true] %s822_s20 }
  0x18   : > { %975 = vmatprep.subr.mxu0 %v258_v4  ;;  %988 = vmatpush3.msra.mxu1 %v380_v3  ;;  %v374_v15 = vld [vmem:[%s1451_s4 + $0x40] sm:$0xff]  ;;  %v373_v16 = vld [vmem:[%s1451_s4 + $0x38] sm:$0xff]  ;;  %v372_v17 = vld [vmem:[%s1451_s4 + $0x30] sm:$0xff]  ;;  %s1134_s25 = scalar_lea.vmem %s1398_s20, 512  ;;  %s1138_s12 = sshll.u32 %s1196_s11, 4  ;;  %s1139_s12 = int_to_ptr.vmem [resolvable:$false] %s1138_s12 }
  0x19   : > { %976 = vmatpush3.msra.mxu0 %v258_v4  ;;  %989 = vmatprep.subr.mxu1 %v379_v5  ;;  %v371_v18 = vld [vmem:[%s1451_s4 + $0x28] sm:$0xff]  ;;  %v370_v19 = vld [vmem:[%s1451_s4 + $0x20] sm:$0xff]  ;;  %v369_v20 = vld [vmem:[%s1451_s4 + $0x18] sm:$0xff]  ;;  %p1135_p11 = scmp.ne.s32.totalorder %s1398_s20, %s1134_s25  ;;  %s1140_s14 = scalar_lea.vmem %s1139_s12, 1024 }
  0x1a   : > { %977 = vmatprep.subr.mxu0 %v257_v6  ;;  %990 = vmatpush3.msra.mxu1 %v379_v5  ;;  %v368_v21 = vld [vmem:[%s1451_s4 + $0x10] sm:$0xff]  ;;  %v367_v22 = vld [vmem:[%s1451_s4 + $0x8] sm:$0xff]  ;;  %v366_v23 = vld [vmem:[%s1451_s4] sm:$0xff]  ;;  %p1141_p0 = scmp.lt.s32.totalorder %s1398_s20, %s1139_s12  ;;  %p1142_p1 = scmp.lt.s32.totalorder %s1140_s14, %s1134_s25 }
  0x1b   : > { %978 = vmatpush3.msra.mxu0 %v257_v6  ;;  %979 = vmatprep.mubr.msk.f32.mxu0 %vm268_vm0, %v253_v7  ;;  %v891_v24 = vld [vmem:[%s1449_s2] ss:$0 sm:$0xff]  ;;  %v589_v37 = vld [vmem:[%s1452_s5 + $0x8] sm:$0xff]  ;;  %p1136_p12 = pnand %p1135_p11, %p1272_p5 }
  0x1c   : > { %980 = vmatmul.mubr.msk.f32.vlgmr.msra.gmra.mxu0 %vm268_vm0, %v254_v8  ;;  %1023 = vmatprep.subr.mxu0 %v381_v2  ;;  %v588_v38 = vld [vmem:[%s1452_s5] sm:$0xff]  ;;  %p1143_p2 = por %p1142_p1, %p1141_p0 }
  0x1d   : > { %982 = vmatprep.mubr.msk.f32.mxu0 %vm268_vm0, %v255_v9  ;;  %1024 = vmatpush3.msra.mxu0 %v381_v2  ;;  %p1137_p13 = pneg %p1136_p12 }
  0x1e   : > { %1025 = vmatprep.subr.mxu0 %v380_v3  ;;  %991 = vmatprep.subr.mxu1 %v378_v10 }
  0x1f   : > { %1026 = vmatpush3.msra.mxu0 %v380_v3  ;;  %992 = vmatpush3.msra.mxu1 %v378_v10  ;;  %p1144_p3 = pnand %p1143_p2, %p1137_p13 }
  0x20   : > { %983 = vmatmul.mubr.msk.f32.gmra.mxu0 %vm268_vm0, %v256_v11  ;;  %1027 = vmatprep.subr.mxu0 %v379_v5 }
  0x21   : > { %1028 = vmatpush3.msra.mxu0 %v379_v5  ;;  %993 = vmatprep.subr.mxu1 %v377_v12 }
  0x22   : > { %1029 = vmatprep.subr.mxu0 %v378_v10  ;;  %994 = vmatpush3.msra.mxu1 %v377_v12 }
  0x23   : > { %1030 = vmatpush3.msra.mxu0 %v378_v10  ;;  %995 = vmatprep.subr.mxu1 %v376_v13 }
  0x24   : > { %1031 = vmatprep.subr.mxu0 %v377_v12  ;;  %996 = vmatpush3.msra.mxu1 %v376_v13 }
  0x25   : > { %1032 = vmatpush3.msra.mxu0 %v377_v12  ;;  %997 = vmatprep.subr.mxu1 %v375_v14 }
  0x26   : > { %1033 = vmatprep.subr.mxu0 %v376_v13  ;;  %998 = vmatpush3.msra.mxu1 %v375_v14 }
  0x27   : > { %1034 = vmatpush3.msra.mxu0 %v376_v13  ;;  %999 = vmatprep.subr.mxu1 %v374_v15 }
  0x28   : > { %1035 = vmatprep.subr.mxu0 %v375_v14  ;;  %1000 = vmatpush3.msra.mxu1 %v374_v15 }
  0x29   : > { %1036 = vmatpush3.msra.mxu0 %v375_v14  ;;  %1001 = vmatprep.subr.mxu1 %v373_v16 }
  0x2a   : > { %1037 = vmatprep.subr.mxu0 %v374_v15  ;;  %1002 = vmatpush3.msra.mxu1 %v373_v16 }
  0x2b   : > { %1038 = vmatpush3.msra.mxu0 %v374_v15  ;;  %1003 = vmatprep.subr.mxu1 %v372_v17 }
  0x2c   : > { %1039 = vmatprep.subr.mxu0 %v373_v16  ;;  %1004 = vmatpush3.msra.mxu1 %v372_v17 }
  0x2d   : > { %1040 = vmatpush3.msra.mxu0 %v373_v16  ;;  %1005 = vmatprep.subr.mxu1 %v371_v18 }
  0x2e   : > { %1041 = vmatprep.subr.mxu0 %v372_v17  ;;  %1006 = vmatpush3.msra.mxu1 %v371_v18 }
  0x2f   : > { %1042 = vmatpush3.msra.mxu0 %v372_v17  ;;  %1007 = vmatprep.subr.mxu1 %v370_v19 }
  0x30   : > { %1043 = vmatprep.subr.mxu0 %v371_v18  ;;  %1008 = vmatpush3.msra.mxu1 %v370_v19 }
  0x31   : > { %1044 = vmatpush3.msra.mxu0 %v371_v18  ;;  %1009 = vmatprep.subr.mxu1 %v369_v20 }
  0x32   : > { %1045 = vmatprep.subr.mxu0 %v370_v19  ;;  %1010 = vmatpush3.msra.mxu1 %v369_v20 }
  0x33   : > { %1046 = vmatpush3.msra.mxu0 %v370_v19  ;;  %1011 = vmatprep.subr.mxu1 %v368_v21  ;;  %v904_v19 = vld [vmem:[%s1450_s3] ss:$0 sm:$0xff] }
  0x34   : > { %1047 = vmatprep.subr.mxu0 %v369_v20  ;;  %1012 = vmatpush3.msra.mxu1 %v368_v21 }
  0x35   : > { %1048 = vmatpush3.msra.mxu0 %v369_v20  ;;  %1013 = vmatprep.subr.mxu1 %v367_v22 }
  0x36   : > { %1049 = vmatprep.subr.mxu0 %v368_v21  ;;  %1014 = vmatpush3.msra.mxu1 %v367_v22 }
  0x37   : > { %1050 = vmatpush3.msra.mxu0 %v368_v21  ;;  %1015 = vmatprep.subr.mxu1 %v366_v23 }
  0x38   : > { %1051 = vmatprep.subr.mxu0 %v367_v22  ;;  %1016 = vmatpush3.msra.mxu1 %v366_v23 }
  0x39   : > { %1052 = vmatpush3.msra.mxu0 %v367_v22  ;;  %1061 = vmatprep.subr.mxu1 %v589_v37 }
  0x3a   : > { %1053 = vmatprep.subr.mxu0 %v366_v23 }
  0x3b   : > { %1054 = vmatpush3.msra.mxu0 %v366_v23 }
  0x3c   : > { %1071 = vmatprep.subr.mxu0 %v589_v37 }
  0xdc   : > { %v981_v25 = vpop.f32.mrf.mxu0 }
  0xdd   : > { %v1353_v26 = vadd.f32 %v981_v25, %v891_v24 }
  0xde   : > { %v347_v27 = vpop.f32.mrf.mxu0 }
  0xdf   : > { %v1355_v28 = vadd.f32 %v891_v24, %v347_v27  ;;  %v468_v31 = vmul.f32 %v1353_v26, %v1353_v26 }
  0xe0   : > { %v984_v29 = vpop.f32.mrf.mxu0 }
  0xe1   : > { %1017 = vmatprep.mubr.f32.mxu1 %v1355_v28  ;;  %v467_v30 = vmul.f32 %v1355_v28, %v1355_v28  ;;  %v1362_v32 = vadd.f32 %v984_v29, %v891_v24 }
  0xe2   : > { %v357_v33 = vpop.f32.mrf.mxu0  ;;  %1018 = vmatmul.mubr.f32.vlgmr.msra.gmra.mxu1 %v1353_v26 }
  0xe3   : > { %v1365_v34 = vadd.f32 %v891_v24, %v357_v33  ;;  %1055 = vmatprep.mubr.f32.mxu0 %v467_v30  ;;  %v470_v36 = vmul.f32 %v1362_v32, %v1362_v32  ;;  %1062 = vmatpush3.msra.mxu1 %v589_v37 }
  0xe4   : > { %1056 = vmatmul.mubr.f32.vlgmr.msra.gmra.mxu0 %v468_v31  ;;  %1063 = vmatprep.subr.mxu1 %v588_v38 }
  0xe5   : > { %1020 = vmatprep.mubr.f32.mxu1 %v1365_v34  ;;  %v469_v35 = vmul.f32 %v1365_v34, %v1365_v34  ;;  %1072 = vmatpush3.msra.mxu0 %v589_v37 }
  0xe6   : > { %1021 = vmatmul.mubr.f32.gmra.mxu1 %v1362_v32  ;;  %1073 = vmatprep.subr.mxu0 %v588_v38 }
  0xe7   : > { %1058 = vmatprep.mubr.f32.mxu0 %v469_v35  ;;  %1064 = vmatpush3.msra.mxu1 %v588_v38 }
  0xe8   : > { %1059 = vmatmul.mubr.f32.gmra.mxu0 %v470_v36  ;;  %1081 = vmatprep.subr.mxu1 %v589_v37 }
  0xe9   : > { %1074 = vmatpush3.msra.mxu0 %v588_v38 }
 0x1a2   : > { %v1019_v39 = vpop.f32.mrf.mxu1 }
 0x1a3   : > { %v557_v40 = vmul.f32 0.125, %v1019_v39 }
 0x1a4   : > { %v448_v41 = vpop.f32.mrf.mxu1  ;;  %v1057_v42 = vpop.f32.mrf.mxu0 }
 0x1a5   : > { %v565_v43 = vmul.f32 %v557_v40, %v557_v40  ;;  %v556_v44 = vmul.f32 0.125, %v448_v41  ;;  %v561_v45 = vmul.f32 0.125, %v1057_v42  ;;  %v581_v6 = vsub.f32 0.0, %v557_v40 }
 0x1a6   : > { %v1022_v46 = vpop.f32.mrf.mxu1  ;;  %v537_v47 = vpop.f32.mrf.mxu0 }
 0x1a7   : > { %v564_v48 = vmul.f32 %v556_v44, %v556_v44  ;;  %v569_v49 = vsub.f32 %v561_v45, %v565_v43  ;;  %v559_v50 = vmul.f32 0.125, %v1022_v46  ;;  %v560_v51 = vmul.f32 0.125, %v537_v47 }
 0x1a8   : > { %v458_v52 = vpop.f32.mrf.mxu1  ;;  %v1060_v53 = vpop.f32.mrf.mxu0  ;;  %v580_v4 = vsub.f32 0.0, %v556_v44 }
 0x1a9   : > { %v573_v54 = vadd.f32 1e-05, %v569_v49  ;;  %v567_v55 = vmul.f32 %v559_v50, %v559_v50  ;;  %v558_v56 = vmul.f32 0.125, %v458_v52  ;;  %v568_v57 = vsub.f32 %v560_v51, %v564_v48 }
 0x1aa   : > { %v563_v58 = vmul.f32 0.125, %v1060_v53  ;;  %v547_v59 = vpop.f32.mrf.mxu0  ;;  %v583_v13 = vsub.f32 0.0, %v559_v50 }
 0x1ab   : > { %v566_v60 = vmul.f32 %v558_v56, %v558_v56  ;;  %v562_v61 = vmul.f32 0.125, %v547_v59  ;;  %v572_v62 = vadd.f32 1e-05, %v568_v57  ;;  %1126 = vrsqrt.f32 %v573_v54 }
 0x1ac   : > { %v571_v63 = vsub.f32 %v563_v58, %v567_v55  ;;  %v582_v8 = vsub.f32 0.0, %v558_v56 }
 0x1ad   : > { %v570_v0 = vsub.f32 %v562_v61, %v566_v60  ;;  %1128 = vrsqrt.f32 %v572_v62 }
 0x1ae   : > { %v575_v1 = vadd.f32 1e-05, %v571_v63 }
 0x1af   : > { %v574_v2 = vadd.f32 1e-05, %v570_v0 }
 0x1b1   : > { %1130 = vrsqrt.f32 %v574_v2 }
 0x1b2   : > { %1132 = vrsqrt.f32 %v575_v1 }
 0x1b8   : > { %v1127_v3 = vpop.eup %1126 }
 0x1b9   : > { %v585_v9 = vmul.f32 %v1127_v3, %v581_v6 }
 0x1ba   : > { %v1129_v5 = vpop.eup %1128 }
 0x1bb   : > { %1065 = vmatprep.mubr.msk.f32.mxu1 %vm590_vm1, %v1129_v5  ;;  %v584_v7 = vmul.f32 %v1129_v5, %v580_v4 }
 0x1bc   : > { %1066 = vmatmul.mubr.msk.f32.vlgmr.msra.gmra.mxu1 %vm590_vm1, %v1127_v3 }
 0x1bd   : > { %1083 = vmatpush3.msra.mxu1 %v589_v37  ;;  %1075 = vmatprep.mubr.msk.f32.mxu0 %vm590_vm1, %v584_v7 }
 0x1be   : > { %v1131_v10 = vpop.eup %1130  ;;  %1076 = vmatmul.mubr.msk.f32.vlgmr.msra.gmra.mxu0 %vm590_vm1, %v585_v9  ;;  %1082 = vmatprep.subr.mxu1 %v588_v38 }
 0x1bf   : > { %1068 = vmatprep.mubr.msk.f32.mxu1 %vm590_vm1, %v1131_v10  ;;  %v586_v11 = vmul.f32 %v1131_v10, %v582_v8  ;;  %v1133_v12 = vpop.eup %1132  ;;  %1084 = vmatpush3.msra.mxu1 %v588_v38 }
 0x1c0   : > { %1069 = vmatmul.mubr.msk.f32.gmra.mxu1 %vm590_vm1, %v1133_v12  ;;  %v587_v14 = vmul.f32 %v1133_v12, %v583_v13 }
 0x1c1   : > { %1078 = vmatprep.mubr.msk.f32.mxu1 %vm590_vm1, %v586_v11 }
 0x1c4   : > { %1079 = vmatmul.mubr.msk.f32.vlgmr.msra.gmra.mxu1 %vm590_vm1, %v587_v14 }
 0x27c   : > { %v1067_v15 = vpop.f32.mrf.mxu1 }
 0x27d   : > { %v786_v16 = vmul.f32 %v1067_v15, %v1353_v26 }
 0x27e   : > { %v669_v17 = vpop.f32.mrf.mxu1  ;;  %v1077_v18 = vpop.f32.mrf.mxu0 }
 0x27f   : > { %v785_v20 = vmul.f32 %v669_v17, %v1355_v28  ;;  %v790_v21 = vadd.f32 %v1077_v18, %v786_v16 }
 0x280   : > { %v1070_v22 = vpop.f32.mrf.mxu1  ;;  %v766_v23 = vpop.f32.mrf.mxu0 }
 0x281   : > { %v801_v24 = vadd.f32 %v904_v19, %v790_v21  ;;  %v789_v25 = vadd.f32 %v785_v20, %v766_v23  ;;  %v788_v26 = vmul.f32 %v1070_v22, %v1362_v32 }
 0x282   : > { %v679_v27 = vpop.f32.mrf.mxu1 }
 0x283   : > { %805 = vst [vmem:[%s245_s19 + $0x8] sm:$0xff] %v801_v24  ;;  %v800_v29 = vadd.f32 %v904_v19, %v789_v25  ;;  %v787_v31 = vmul.f32 %v679_v27, %v1365_v34 }
 0x284   : > { %v1080_v30 = vpop.f32.mrf.mxu1 }
 0x285   : > { %804 = vst [vmem:[%s245_s19] sm:$0xff] %v800_v29  ;;  %v792_v28 = vadd.f32 %v1080_v30, %v788_v26 }
 0x286   : > { %v776_v33 = vpop.f32.mrf.mxu1 }
 0x287   : > { %v803_v35 = vadd.f32 %v904_v19, %v792_v28  ;;  %v791_v36 = vadd.f32 %v787_v31, %v776_v33 }
 0x289   : > { %807 = vst [vmem:[%s245_s19 + $0x18] sm:$0xff] %v803_v35  ;;  %v802_v32 = vadd.f32 %v904_v19, %v791_v36 }
 0x28b   : > { %806 = vst [vmem:[%s245_s19 + $0x10] sm:$0xff] %v802_v32 }
 0x28c   : > { %1147 = shalt.err (!%p1144_p3)
}
 0x28d   : > { %s1148_s15 = scalar_lea.hbm %s1403_s9, 512  ;;  %s1152_s17 = scalar_lea.hbm %s1453_s6, 1024 }
 0x28e   : > { %p1149_p4 = scmp.ne.s32.totalorder %s1403_s9, %s1148_s15  ;;  %p1153_p9 = scmp.lt.s32.totalorder %s1403_s9, %s1453_s6 }
 0x28f   : > { %p1154_p10 = scmp.lt.s32.totalorder %s1152_s17, %s1148_s15 }
 0x290   : > { %p1150_p7 = pnand %p1149_p4, %p1272_p5 }
 0x291   : > { %p1155_p11 = por %p1154_p10, %p1153_p9 }
 0x292   : > { %p1151_p8 = pneg %p1150_p7 }
 0x294   : > { %p1156_p12 = pnand %p1155_p11, %p1151_p8 }
 0x296   : > { %1159 = shalt.err (!%p1156_p12)
}
 0x297   : > { %s1197_s26 = smov 128   ;;  %s1198_s28 = smov 8  }
 0x298   : > { %1085 = dma.vmem_to_hbm [thread:$0]  (%p1272_p5), %s1398_s20, 512, %s1403_s9, %s1407_s10, %s1197_s26, %s1197_s26, %s1198_s28  }
 0x299 PF: > { %p1091_p13 = scmp.ge.s32.totalorder %s1194_s24, 2  ;;  %s837_s29 = sand.u32 1, %s1182_s21  }
 0x29a   : > { %s838_s25 = scalar_lea.sflag [#allocation3], %s837_s29 }
 0x29b   : > { %p1088_p0 = pnand %p1091_p13, %p1276_p6 }
 0x29d   : > { %p1089_p1 = pneg %p1088_p0 }
 0x29f   : > { %1177 = dma.done.wait (%p1089_p1), %s838_s25, 512  }
 0x2a0   : > { %1179 = vsyncadd (%p1089_p1), %s838_s25, 4294966784  ;;  %p16_p2 = scmp.ge.s32.totalorder %s1259_s27, 4   ;;  %s1456_s21 = smov %s1186_s22 }
 0x2a1   : > { %s1457_s22 = smov %s1190_s23  ;;  %s1458_s23 = smov %s1270_s30 }
 0x2a2   : > { %s1459_s24 = smov %s1259_s27  ;;  %18 = sbr.rel (!%p16_p2) target bundleno = 3 (0x3), region = 79 }
 0x2a7   :  { %843 = vsyncpa [#allocation3], 1 }
 0x2a8   :  { %845 = vsyncpa [#allocation3 + $0x1], 1 }

</bundles_post_ra>
